<compile_context>
chip_gen: v6e
topology: v6e:2x2x1
jax: 0.10.0
libtpu: 0.0.40
codegen_flags: <defaults>
</compile_context>

<pallas_src>
import jax
import jax.numpy as jnp
from jax.experimental import pallas as pl
from jax.experimental.pallas import tpu as pltpu


def _psi_x_kernel(w_ref, c_ref, yt_ref, ut_ref, ot_ref):
    """out^T = tanh(Wy^T @ y^T + Wu^T @ u^T + c^T) for one batch tile.

    w_ref : SMEM [n+m, n] f32   stacked [Wy; Wu]
    c_ref : SMEM [1, n]   f32   t*wt + b (time term + bias folded outside)
    yt_ref: VMEM [n, tb]        state tile, batch on the lane axis
    ut_ref: VMEM [m, tb]        control tile
    ot_ref: VMEM [n, tb]        output tile
    """
    n = ot_ref.shape[0]
    m = ut_ref.shape[0]
    yt = yt_ref[...].astype(jnp.float32)          # [n, tb]  (bf16 -> f32 upconvert)
    ut = ut_ref[...].astype(jnp.float32)          # [m, tb]

    rows = []
    for j in range(n):                            # static unroll, n = 4
        # scalar (SMEM) x vector multiply-adds on the VPU
        hj = c_ref[0, j] + w_ref[0, j] * yt[0:1, :]
        for k in range(1, n):
            hj = hj + w_ref[k, j] * yt[k:k + 1, :]
        for k in range(m):
            hj = hj + w_ref[n + k, j] * ut[k:k + 1, :]
        rows.append(hj)                           # [1, tb] each
    h = jnp.concatenate(rows, axis=0)             # [n, tb]
    ot_ref[...] = jnp.tanh(h).astype(ot_ref.dtype)   # tanh on EUP, single store


def _round_up(x, m):
    return ((x + m - 1) // m) * m


def psi_x_dynamics_t(t, yt, ut, w_stacked, wt, b, *,
                     tb_max=64 * 1024, small_batch_threshold=1024):
    """f(t, y, u) in transposed (lane-dense) layout.

    yt: [n, B], ut: [m, B]  ->  [n, B] = tanh(Wy^T yt + Wu^T ut + (t*wt + b)^T)

    w_stacked = concat([Wy, Wu], axis=0), shape [n+m, n] (built once).
    Streaming dtype follows yt/ut (bf16 halves HBM bytes); math is f32.
    """
    n = w_stacked.shape[1]
    m = w_stacked.shape[0] - n
    assert yt.shape[0] == n and ut.shape[0] == m
    B = yt.shape[1]
    assert ut.shape[1] == B
    out_dtype = yt.dtype

    # Fold time term + bias into a tiny [1, n] f32 constant (outside the
    # streamed path -> two fewer full-width rows of HBM traffic).
    c = jnp.float32(t) * wt.astype(jnp.float32) + b.astype(jnp.float32)   # [1, n]
    w32 = w_stacked.astype(jnp.float32)                                   # [n+m, n]

    # Small batches: XLA fusion beats the pallas_call launch + padding.
    if B < small_batch_threshold:
        h = (w32[:n].T @ yt.astype(jnp.float32)
             + w32[n:].T @ ut.astype(jnp.float32)
             + c.T)
        return jnp.tanh(h).astype(out_dtype)

    # Batch tiling: big lane-dense tiles amortize the per-grid-step overhead,
    # but keep >= 2 tiles when possible so v7x can shard across both TCs.
    b_pad = _round_up(B, 128)
    tb = min(b_pad, _round_up(tb_max, 128))
    if b_pad // tb < 2 and b_pad >= 256:
        tb = _round_up(pl.cdiv(b_pad, 2), 128)
    b_pad = _round_up(b_pad, tb)
    grid = (b_pad // tb,)

    if b_pad != B:
        yt = jnp.pad(yt, ((0, 0), (0, b_pad - B)))
        ut = jnp.pad(ut, ((0, 0), (0, b_pad - B)))

    out_t = pl.pallas_call(
        _psi_x_kernel,
        out_shape=jax.ShapeDtypeStruct((n, b_pad), out_dtype),
        grid=grid,
        in_specs=[
            # 24 + 4 floats of parameters -> SMEM, read as scalars in-kernel.
            pl.BlockSpec(memory_space=pltpu.MemorySpace.SMEM),
            pl.BlockSpec(memory_space=pltpu.MemorySpace.SMEM),
            # Batch tiles, batch on the lane axis (lane-dense stores).
            pl.BlockSpec((n, tb), lambda i: (0, i)),
            pl.BlockSpec((m, tb), lambda i: (0, i)),
        ],
        out_specs=pl.BlockSpec((n, tb), lambda i: (0, i)),
        compiler_params=pltpu.CompilerParams(
            # Independent batch tiles -> both TensorCores on v7x.
            dimension_semantics=("parallel",),
        ),
    )(w32, c, yt, ut)

    if b_pad != B:
        out_t = out_t[:, :B]
    return out_t


def psi_x_dynamics(t, y, u, w_stacked, wt, b, **kwargs):
    """Module-layout convenience wrapper: y [B, n], u [B, m] -> [B, n].

    For the roofline-bound regime prefer psi_x_dynamics_t and carry the
    solver state transposed so these .T's disappear entirely.
    """
    return psi_x_dynamics_t(t, y.T, u.T, w_stacked, wt, b, **kwargs).T


class PsiX:
    """JAX port of the PyTorch PsiX module (pass-through wrapper around f)."""

    def __init__(self, f):
        # n = 4, m = 2 in the original __init__ are unused there as well.
        self.f = f

    def __call__(self, t, omega):
        y, u = omega
        psi_x = self.f(t, y, u)
        omega_ = 0
        return (psi_x, omega_)


if __name__ == "__main__":
    n, m = 4, 2  # state dim, control dim (as in the original module)

    key = jax.random.PRNGKey(0)
    k_wy, k_wu, k_wt, k_b, k_y, k_u, k_yt, k_ut = jax.random.split(key, 8)

    # Deterministic synthetic parameters (no checkpoint load).
    wy = jax.random.normal(k_wy, (n, n), dtype=jnp.float32) * 0.5
    wu = jax.random.normal(k_wu, (m, n), dtype=jnp.float32) * 0.5
    wt = jax.random.normal(k_wt, (1, n), dtype=jnp.float32) * 0.1
    b = jax.random.normal(k_b, (1, n), dtype=jnp.float32) * 0.1

    # Stack Wy/Wu once, outside the hot path.
    w_stacked = jnp.concatenate([wy, wu], axis=0)            # [n+m, n]
    t = jnp.float32(0.5)

    # Dynamics function bound to the Pallas-backed implementation.
    def f(t_, y_, u_):
        return psi_x_dynamics(t_, y_, u_, w_stacked, wt, b)

    model = PsiX(f)

    # --- module-shaped tiny batch (small-B jnp fast path) --------------------
    B0 = 8
    y = jax.random.normal(k_y, (B0, n), dtype=jnp.float32)
    u = jax.random.normal(k_u, (B0, m), dtype=jnp.float32)
    psi_x, omega_ = model(t, (y, u))
    psi_x = jax.block_until_ready(psi_x)
    ref0 = jnp.tanh(y @ wy + u @ wu + t * wt + b)
    assert psi_x.shape == (B0, n)
    assert omega_ == 0
    assert jnp.allclose(psi_x, ref0, atol=1e-5, rtol=1e-5)

    # --- Pallas path: transposed layout, multi-tile grid, f32 streaming ------
    B1 = 2048
    yt = jax.random.normal(k_yt, (n, B1), dtype=jnp.float32)
    ut = jax.random.normal(k_ut, (m, B1), dtype=jnp.float32)
    out_t = psi_x_dynamics_t(t, yt, ut, w_stacked, wt, b, tb_max=512)  # grid=(4,)
    out_t = jax.block_until_ready(out_t)
    ref_t = jnp.tanh(wy.T @ yt + wu.T @ ut + (t * wt + b).T)
    assert out_t.shape == (n, B1)
    assert jnp.allclose(out_t, ref_t, atol=1e-5, rtol=1e-5)

    # --- Pallas path: bf16 streaming (half the HBM bytes), f32 math in-kernel
    out_bf = psi_x_dynamics_t(t, yt.astype(jnp.bfloat16), ut.astype(jnp.bfloat16),
                              w_stacked, wt, b, tb_max=512)
    out_bf = jax.block_until_ready(out_bf)
    assert out_bf.dtype == jnp.bfloat16
    assert jnp.allclose(out_bf.astype(jnp.float32), ref_t, atol=5e-2, rtol=5e-2)

    print("KERNEL_OK")
</pallas_src>

<mosaic_0001>
module attributes {stable_mosaic.version = 11 : i64} {
  func.func @_psi_x_kernel(%arg0: i32, %arg1: memref<6x4xf32, #tpu.memory_space<smem>>, %arg2: memref<1x4xf32, #tpu.memory_space<smem>>, %arg3: memref<4x512xf32, #tpu.memory_space<vmem>>, %arg4: memref<2x512xf32, #tpu.memory_space<vmem>>, %arg5: memref<4x512xf32, #tpu.memory_space<vmem>>) attributes {dimension_semantics = [#tpu.dimension_semantics<parallel>], iteration_bounds = array<i64: 4>, scalar_prefetch = 0 : i64, scratch_operands = 0 : i64, tpu.core_type = #tpu.core_type<tc>, window_params = [{transform_indices = @transform_0, window_bounds = array<i64: 6, 4>}, {transform_indices = @transform_1, window_bounds = array<i64: 1, 4>}, {transform_indices = @transform_2, window_bounds = array<i64: 4, 512>}, {transform_indices = @transform_3, window_bounds = array<i64: 2, 512>}, {transform_indices = @transform_4, window_bounds = array<i64: 4, 512>}]} {
    %c0 = arith.constant 0 : index
    %c0_0 = arith.constant 0 : index
    %0 = vector.load %arg3[%c0, %c0_0] : memref<4x512xf32, #tpu.memory_space<vmem>>, vector<4x512xf32>
    %c0_1 = arith.constant 0 : index
    %c0_2 = arith.constant 0 : index
    %1 = vector.load %arg4[%c0_1, %c0_2] : memref<2x512xf32, #tpu.memory_space<vmem>>, vector<2x512xf32>
    %c0_3 = arith.constant 0 : index
    %c0_4 = arith.constant 0 : index
    %2 = memref.load %arg2[%c0_3, %c0_4] : memref<1x4xf32, #tpu.memory_space<smem>>
    %c0_5 = arith.constant 0 : index
    %c0_6 = arith.constant 0 : index
    %3 = memref.load %arg1[%c0_5, %c0_6] : memref<6x4xf32, #tpu.memory_space<smem>>
    %4 = vector.extract_strided_slice %0 {offsets = [0, 0], sizes = [1, 512], strides = [1, 1]} : vector<4x512xf32> to vector<1x512xf32>
    %5 = vector.broadcast %3 : f32 to vector<1x512xf32>
    %6 = arith.mulf %5, %4 : vector<1x512xf32>
    %7 = vector.broadcast %2 : f32 to vector<1x512xf32>
    %8 = arith.addf %7, %6 : vector<1x512xf32>
    %c1 = arith.constant 1 : index
    %c0_7 = arith.constant 0 : index
    %9 = memref.load %arg1[%c1, %c0_7] : memref<6x4xf32, #tpu.memory_space<smem>>
    %10 = vector.extract_strided_slice %0 {offsets = [1, 0], sizes = [1, 512], strides = [1, 1]} : vector<4x512xf32> to vector<1x512xf32>
    %11 = vector.broadcast %9 : f32 to vector<1x512xf32>
    %12 = arith.mulf %11, %10 : vector<1x512xf32>
    %13 = arith.addf %8, %12 : vector<1x512xf32>
    %c2 = arith.constant 2 : index
    %c0_8 = arith.constant 0 : index
    %14 = memref.load %arg1[%c2, %c0_8] : memref<6x4xf32, #tpu.memory_space<smem>>
    %15 = vector.extract_strided_slice %0 {offsets = [2, 0], sizes = [1, 512], strides = [1, 1]} : vector<4x512xf32> to vector<1x512xf32>
    %16 = vector.broadcast %14 : f32 to vector<1x512xf32>
    %17 = arith.mulf %16, %15 : vector<1x512xf32>
    %18 = arith.addf %13, %17 : vector<1x512xf32>
    %c3 = arith.constant 3 : index
    %c0_9 = arith.constant 0 : index
    %19 = memref.load %arg1[%c3, %c0_9] : memref<6x4xf32, #tpu.memory_space<smem>>
    %20 = vector.extract_strided_slice %0 {offsets = [3, 0], sizes = [1, 512], strides = [1, 1]} : vector<4x512xf32> to vector<1x512xf32>
    %21 = vector.broadcast %19 : f32 to vector<1x512xf32>
    %22 = arith.mulf %21, %20 : vector<1x512xf32>
    %23 = arith.addf %18, %22 : vector<1x512xf32>
    %c4 = arith.constant 4 : index
    %c0_10 = arith.constant 0 : index
    %24 = memref.load %arg1[%c4, %c0_10] : memref<6x4xf32, #tpu.memory_space<smem>>
    %25 = vector.extract_strided_slice %1 {offsets = [0, 0], sizes = [1, 512], strides = [1, 1]} : vector<2x512xf32> to vector<1x512xf32>
    %26 = vector.broadcast %24 : f32 to vector<1x512xf32>
    %27 = arith.mulf %26, %25 : vector<1x512xf32>
    %28 = arith.addf %23, %27 : vector<1x512xf32>
    %c5 = arith.constant 5 : index
    %c0_11 = arith.constant 0 : index
    %29 = memref.load %arg1[%c5, %c0_11] : memref<6x4xf32, #tpu.memory_space<smem>>
    %30 = vector.extract_strided_slice %1 {offsets = [1, 0], sizes = [1, 512], strides = [1, 1]} : vector<2x512xf32> to vector<1x512xf32>
    %31 = vector.broadcast %29 : f32 to vector<1x512xf32>
    %32 = arith.mulf %31, %30 : vector<1x512xf32>
    %33 = arith.addf %28, %32 : vector<1x512xf32>
    %c0_12 = arith.constant 0 : index
    %c1_13 = arith.constant 1 : index
    %34 = memref.load %arg2[%c0_12, %c1_13] : memref<1x4xf32, #tpu.memory_space<smem>>
    %c0_14 = arith.constant 0 : index
    %c1_15 = arith.constant 1 : index
    %35 = memref.load %arg1[%c0_14, %c1_15] : memref<6x4xf32, #tpu.memory_space<smem>>
    %36 = vector.extract_strided_slice %0 {offsets = [0, 0], sizes = [1, 512], strides = [1, 1]} : vector<4x512xf32> to vector<1x512xf32>
    %37 = vector.broadcast %35 : f32 to vector<1x512xf32>
    %38 = arith.mulf %37, %36 : vector<1x512xf32>
    %39 = vector.broadcast %34 : f32 to vector<1x512xf32>
    %40 = arith.addf %39, %38 : vector<1x512xf32>
    %c1_16 = arith.constant 1 : index
    %c1_17 = arith.constant 1 : index
    %41 = memref.load %arg1[%c1_16, %c1_17] : memref<6x4xf32, #tpu.memory_space<smem>>
    %42 = vector.extract_strided_slice %0 {offsets = [1, 0], sizes = [1, 512], strides = [1, 1]} : vector<4x512xf32> to vector<1x512xf32>
    %43 = vector.broadcast %41 : f32 to vector<1x512xf32>
    %44 = arith.mulf %43, %42 : vector<1x512xf32>
    %45 = arith.addf %40, %44 : vector<1x512xf32>
    %c2_18 = arith.constant 2 : index
    %c1_19 = arith.constant 1 : index
    %46 = memref.load %arg1[%c2_18, %c1_19] : memref<6x4xf32, #tpu.memory_space<smem>>
    %47 = vector.extract_strided_slice %0 {offsets = [2, 0], sizes = [1, 512], strides = [1, 1]} : vector<4x512xf32> to vector<1x512xf32>
    %48 = vector.broadcast %46 : f32 to vector<1x512xf32>
    %49 = arith.mulf %48, %47 : vector<1x512xf32>
    %50 = arith.addf %45, %49 : vector<1x512xf32>
    %c3_20 = arith.constant 3 : index
    %c1_21 = arith.constant 1 : index
    %51 = memref.load %arg1[%c3_20, %c1_21] : memref<6x4xf32, #tpu.memory_space<smem>>
    %52 = vector.extract_strided_slice %0 {offsets = [3, 0], sizes = [1, 512], strides = [1, 1]} : vector<4x512xf32> to vector<1x512xf32>
    %53 = vector.broadcast %51 : f32 to vector<1x512xf32>
    %54 = arith.mulf %53, %52 : vector<1x512xf32>
    %55 = arith.addf %50, %54 : vector<1x512xf32>
    %c4_22 = arith.constant 4 : index
    %c1_23 = arith.constant 1 : index
    %56 = memref.load %arg1[%c4_22, %c1_23] : memref<6x4xf32, #tpu.memory_space<smem>>
    %57 = vector.extract_strided_slice %1 {offsets = [0, 0], sizes = [1, 512], strides = [1, 1]} : vector<2x512xf32> to vector<1x512xf32>
    %58 = vector.broadcast %56 : f32 to vector<1x512xf32>
    %59 = arith.mulf %58, %57 : vector<1x512xf32>
    %60 = arith.addf %55, %59 : vector<1x512xf32>
    %c5_24 = arith.constant 5 : index
    %c1_25 = arith.constant 1 : index
    %61 = memref.load %arg1[%c5_24, %c1_25] : memref<6x4xf32, #tpu.memory_space<smem>>
    %62 = vector.extract_strided_slice %1 {offsets = [1, 0], sizes = [1, 512], strides = [1, 1]} : vector<2x512xf32> to vector<1x512xf32>
    %63 = vector.broadcast %61 : f32 to vector<1x512xf32>
    %64 = arith.mulf %63, %62 : vector<1x512xf32>
    %65 = arith.addf %60, %64 : vector<1x512xf32>
    %c0_26 = arith.constant 0 : index
    %c2_27 = arith.constant 2 : index
    %66 = memref.load %arg2[%c0_26, %c2_27] : memref<1x4xf32, #tpu.memory_space<smem>>
    %c0_28 = arith.constant 0 : index
    %c2_29 = arith.constant 2 : index
    %67 = memref.load %arg1[%c0_28, %c2_29] : memref<6x4xf32, #tpu.memory_space<smem>>
    %68 = vector.extract_strided_slice %0 {offsets = [0, 0], sizes = [1, 512], strides = [1, 1]} : vector<4x512xf32> to vector<1x512xf32>
    %69 = vector.broadcast %67 : f32 to vector<1x512xf32>
    %70 = arith.mulf %69, %68 : vector<1x512xf32>
    %71 = vector.broadcast %66 : f32 to vector<1x512xf32>
    %72 = arith.addf %71, %70 : vector<1x512xf32>
    %c1_30 = arith.constant 1 : index
    %c2_31 = arith.constant 2 : index
    %73 = memref.load %arg1[%c1_30, %c2_31] : memref<6x4xf32, #tpu.memory_space<smem>>
    %74 = vector.extract_strided_slice %0 {offsets = [1, 0], sizes = [1, 512], strides = [1, 1]} : vector<4x512xf32> to vector<1x512xf32>
    %75 = vector.broadcast %73 : f32 to vector<1x512xf32>
    %76 = arith.mulf %75, %74 : vector<1x512xf32>
    %77 = arith.addf %72, %76 : vector<1x512xf32>
    %c2_32 = arith.constant 2 : index
    %c2_33 = arith.constant 2 : index
    %78 = memref.load %arg1[%c2_32, %c2_33] : memref<6x4xf32, #tpu.memory_space<smem>>
    %79 = vector.extract_strided_slice %0 {offsets = [2, 0], sizes = [1, 512], strides = [1, 1]} : vector<4x512xf32> to vector<1x512xf32>
    %80 = vector.broadcast %78 : f32 to vector<1x512xf32>
    %81 = arith.mulf %80, %79 : vector<1x512xf32>
    %82 = arith.addf %77, %81 : vector<1x512xf32>
    %c3_34 = arith.constant 3 : index
    %c2_35 = arith.constant 2 : index
    %83 = memref.load %arg1[%c3_34, %c2_35] : memref<6x4xf32, #tpu.memory_space<smem>>
    %84 = vector.extract_strided_slice %0 {offsets = [3, 0], sizes = [1, 512], strides = [1, 1]} : vector<4x512xf32> to vector<1x512xf32>
    %85 = vector.broadcast %83 : f32 to vector<1x512xf32>
    %86 = arith.mulf %85, %84 : vector<1x512xf32>
    %87 = arith.addf %82, %86 : vector<1x512xf32>
    %c4_36 = arith.constant 4 : index
    %c2_37 = arith.constant 2 : index
    %88 = memref.load %arg1[%c4_36, %c2_37] : memref<6x4xf32, #tpu.memory_space<smem>>
    %89 = vector.extract_strided_slice %1 {offsets = [0, 0], sizes = [1, 512], strides = [1, 1]} : vector<2x512xf32> to vector<1x512xf32>
    %90 = vector.broadcast %88 : f32 to vector<1x512xf32>
    %91 = arith.mulf %90, %89 : vector<1x512xf32>
    %92 = arith.addf %87, %91 : vector<1x512xf32>
    %c5_38 = arith.constant 5 : index
    %c2_39 = arith.constant 2 : index
    %93 = memref.load %arg1[%c5_38, %c2_39] : memref<6x4xf32, #tpu.memory_space<smem>>
    %94 = vector.extract_strided_slice %1 {offsets = [1, 0], sizes = [1, 512], strides = [1, 1]} : vector<2x512xf32> to vector<1x512xf32>
    %95 = vector.broadcast %93 : f32 to vector<1x512xf32>
    %96 = arith.mulf %95, %94 : vector<1x512xf32>
    %97 = arith.addf %92, %96 : vector<1x512xf32>
    %c0_40 = arith.constant 0 : index
    %c3_41 = arith.constant 3 : index
    %98 = memref.load %arg2[%c0_40, %c3_41] : memref<1x4xf32, #tpu.memory_space<smem>>
    %c0_42 = arith.constant 0 : index
    %c3_43 = arith.constant 3 : index
    %99 = memref.load %arg1[%c0_42, %c3_43] : memref<6x4xf32, #tpu.memory_space<smem>>
    %100 = vector.extract_strided_slice %0 {offsets = [0, 0], sizes = [1, 512], strides = [1, 1]} : vector<4x512xf32> to vector<1x512xf32>
    %101 = vector.broadcast %99 : f32 to vector<1x512xf32>
    %102 = arith.mulf %101, %100 : vector<1x512xf32>
    %103 = vector.broadcast %98 : f32 to vector<1x512xf32>
    %104 = arith.addf %103, %102 : vector<1x512xf32>
    %c1_44 = arith.constant 1 : index
    %c3_45 = arith.constant 3 : index
    %105 = memref.load %arg1[%c1_44, %c3_45] : memref<6x4xf32, #tpu.memory_space<smem>>
    %106 = vector.extract_strided_slice %0 {offsets = [1, 0], sizes = [1, 512], strides = [1, 1]} : vector<4x512xf32> to vector<1x512xf32>
    %107 = vector.broadcast %105 : f32 to vector<1x512xf32>
    %108 = arith.mulf %107, %106 : vector<1x512xf32>
    %109 = arith.addf %104, %108 : vector<1x512xf32>
    %c2_46 = arith.constant 2 : index
    %c3_47 = arith.constant 3 : index
    %110 = memref.load %arg1[%c2_46, %c3_47] : memref<6x4xf32, #tpu.memory_space<smem>>
    %111 = vector.extract_strided_slice %0 {offsets = [2, 0], sizes = [1, 512], strides = [1, 1]} : vector<4x512xf32> to vector<1x512xf32>
    %112 = vector.broadcast %110 : f32 to vector<1x512xf32>
    %113 = arith.mulf %112, %111 : vector<1x512xf32>
    %114 = arith.addf %109, %113 : vector<1x512xf32>
    %c3_48 = arith.constant 3 : index
    %c3_49 = arith.constant 3 : index
    %115 = memref.load %arg1[%c3_48, %c3_49] : memref<6x4xf32, #tpu.memory_space<smem>>
    %116 = vector.extract_strided_slice %0 {offsets = [3, 0], sizes = [1, 512], strides = [1, 1]} : vector<4x512xf32> to vector<1x512xf32>
    %117 = vector.broadcast %115 : f32 to vector<1x512xf32>
    %118 = arith.mulf %117, %116 : vector<1x512xf32>
    %119 = arith.addf %114, %118 : vector<1x512xf32>
    %c4_50 = arith.constant 4 : index
    %c3_51 = arith.constant 3 : index
    %120 = memref.load %arg1[%c4_50, %c3_51] : memref<6x4xf32, #tpu.memory_space<smem>>
    %121 = vector.extract_strided_slice %1 {offsets = [0, 0], sizes = [1, 512], strides = [1, 1]} : vector<2x512xf32> to vector<1x512xf32>
    %122 = vector.broadcast %120 : f32 to vector<1x512xf32>
    %123 = arith.mulf %122, %121 : vector<1x512xf32>
    %124 = arith.addf %119, %123 : vector<1x512xf32>
    %c5_52 = arith.constant 5 : index
    %c3_53 = arith.constant 3 : index
    %125 = memref.load %arg1[%c5_52, %c3_53] : memref<6x4xf32, #tpu.memory_space<smem>>
    %126 = vector.extract_strided_slice %1 {offsets = [1, 0], sizes = [1, 512], strides = [1, 1]} : vector<2x512xf32> to vector<1x512xf32>
    %127 = vector.broadcast %125 : f32 to vector<1x512xf32>
    %128 = arith.mulf %127, %126 : vector<1x512xf32>
    %129 = arith.addf %124, %128 : vector<1x512xf32>
    %130 = tpu.concatenate %33, %65, %97, %129 in 0 : vector<1x512xf32>, vector<1x512xf32>, vector<1x512xf32>, vector<1x512xf32> -> vector<4x512xf32>
    %131 = math.tanh %130 : vector<4x512xf32>
    %c0_54 = arith.constant 0 : index
    %c0_55 = arith.constant 0 : index
    %132 = vector.load %arg5[%c0_54, %c0_55] : memref<4x512xf32, #tpu.memory_space<vmem>>, vector<4x512xf32>
    tpu.vector_store %arg5[%c0_54, %c0_55], %131 {strides = array<i32>} : memref<4x512xf32, #tpu.memory_space<vmem>>, vector<4x512xf32>,
    return
  }
  func.func @transform_0(%arg0: i32) -> (i32, i32) {
    %c0_i32 = arith.constant 0 : i32
    %c0_i32_0 = arith.constant 0 : i32
    %c0_i32_1 = arith.constant 0 : i32
    return %c0_i32, %c0_i32_0 : i32, i32
  }
  func.func @transform_1(%arg0: i32) -> (i32, i32) {
    %c0_i32 = arith.constant 0 : i32
    %c0_i32_0 = arith.constant 0 : i32
    %c0_i32_1 = arith.constant 0 : i32
    return %c0_i32, %c0_i32_0 : i32, i32
  }
  func.func @transform_2(%arg0: i32) -> (i32, i32) {
    %c0_i32 = arith.constant 0 : i32
    %c0_i32_0 = arith.constant 0 : i32
    return %c0_i32, %arg0 : i32, i32
  }
  func.func @transform_3(%arg0: i32) -> (i32, i32) {
    %c0_i32 = arith.constant 0 : i32
    %c0_i32_0 = arith.constant 0 : i32
    return %c0_i32, %arg0 : i32, i32
  }
  func.func @transform_4(%arg0: i32) -> (i32, i32) {
    %c0_i32 = arith.constant 0 : i32
    %c0_i32_0 = arith.constant 0 : i32
    return %c0_i32, %arg0 : i32, i32
  }
}

</mosaic_0001>

<bundles_post_ra>
// kernel: tpu_custom_call.1
= control target key start
LH: loop header
LB: loop body
LE: loop exit
PB: predicated region body
PF: predicated region fallthrough
CT: control target
= control target key end

     0   :  { %s1670_s0 = inlined_call_operand.vmem [shape: f32[6,4], index: 0, kind: input, shape index: {}]   ;;  %s1671_s1 = inlined_call_operand.vmem [shape: f32[1,4], index: 1, kind: input, shape index: {}]   ;;  %s1672_s2 = inlined_call_operand.hbm [shape: f32[4,2048], index: 2, kind: input, shape index: {}]   ;;  %s1673_s3 = inlined_call_operand.hbm [shape: f32[2,2048], index: 3, kind: input, shape index: {}]   ;;  %s1674_s4 = inlined_call_operand.hbm [shape: f32[4,2048], index: 4, kind: output, shape index: {}]  }
   0x1   :  { %1679 = sst [smem:[#allocation17_spill]] %s1670_s0 }
   0x2   :  { %1680 = sst [smem:[#allocation18_spill]] %s1671_s1 }
   0x3   :  { %9 = vsyncpa [#allocation5], 0 }
   0x4   :  { %10 = vsyncpa [#allocation7], 0 }
   0x5   :  { %11 = vsyncpa [#allocation3], 0 }
   0x6   :  { %13 = vsyncpa [#allocation3 + $0x1], 0 }
   0x7   :  { %14 = vsyncpa [#allocation10], 0 }
   0x8   :  { %16 = vsyncpa [#allocation10 + $0x1], 0 }
   0x9   :  { %17 = vsyncpa [#allocation4], 0 }
   0xa   :  { %19 = vsyncpa [#allocation4 + $0x1], 0  ;;  %s1265_s15 = smov 0   ;;  %s1267_s16 = smov 0  }
   0xb   :  { %s1269_s17 = smov 0   ;;  %s1271_s18 = smov 0  }
   0xc LB: > { %s1286_s19 = sadd.s32 4294967295, %s1229_s18   ;;  %s908_s20 = sadd.s32 4294967294, %s1229_s18   ;;  %s1229_s18 = sphi %s1271_s18, %s1701_s18   ;;  %s1225_s17 = sphi %s1269_s17, %s1700_s17   ;;  %s1221_s16 = sphi %s1267_s16, %s1699_s16   ;;  %s1217_s15 = sphi %s1265_s15, %s1698_s15  }
   0xd   : > { %p87_p0 = scmp.ne.s32.totalorder %s1221_s16, %s1217_s15  ;;  %p1675_p1 = scmp.eq.s32.totalorder %s1286_s19, 0 }
   0xe   : > { %p143_p3 = scmp.eq.s32.totalorder %s908_s20, 3  ;;  %p909_p5 = scmp.ge.s32.totalorder %s1229_s18, 1 }
   0xf   : > { %p1295_p4 = por %p1675_p1, %p87_p0  ;;  %p150_p7 = scmp.lt.s32.totalorder %s1229_s18, 5 }
  0x10   : > { %p1300_p6 = por %p143_p3, %p87_p0  ;;  %s1683_s0 = sld [smem:[#allocation17_spill]] }
  0x11   : > { %s1681_s21 = scalar_select %p1295_p4, 1, 0 }
  0x12   : > { %s1682_s22 = scalar_select %p1300_p6, 1, 0 }
  0x13   : > { %p1308_p8 = pnand %p909_p5, %p150_p7  ;;  %s1685_s1 = sld [smem:[#allocation18_spill]] }
  0x14   : > { %s1324_s5 = sadd.s32 1, %s1229_s18  }
  0x15   : > { %s1684_s26 = scalar_select %p1308_p8, 1, 0 }
  0x16   : > { %s163_s25 = sshll.u32 %s1683_s0, 4  ;;  %p997_p9 = pneg %p1308_p8  ;;  %s164_s25 = int_to_ptr.vmem [resolvable:$true] %s163_s25 }
  0x17   : > { %s71_s6 = ssub.s32 %s1229_s18, %s1324_s5  ;;  %s1067_s7 = scalar_lea.vmem %s164_s25, 128 }
  0x18   : > { %p1319_p10 = pnand %p997_p9, %p1675_p1  ;;  %p1068_p11 = scmp.ne.s32.totalorder %s164_s25, %s1067_s7 }
  0x19   : > { %s174_s29 = sshll.u32 %s1685_s1, 4  ;;  %p1075_p3 = scmp.lt.s32.totalorder %s164_s25, %s164_s25  ;;  %s175_s29 = int_to_ptr.vmem [resolvable:$true] %s174_s29 }
  0x1a   : > { %p1069_p12 = pneg %p1319_p10  ;;  %p1076_p5 = scmp.lt.s32.totalorder %s1067_s7, %s1067_s7 }
  0x1c   : > { %p1070_p13 = pnand %p1069_p12, %p1068_p11  ;;  %p1077_p7 = por %p1076_p5, %p1075_p3 }
  0x1e   : > { %p1071_p0 = pneg %p1070_p13 }
  0x20   : > { %p1078_p2 = pnand %p1077_p7, %p1071_p0 }
  0x22   : > { %1081 = shalt.err (!%p1078_p2)
}
  0x23   : > { %s1231_s8 = smov [#allocation2]   ;;  %s1082_s9 = scalar_lea.vmem %s175_s29, 16 }
  0x24   : > { %1000 = dma.vmem_to_smem (!%p1319_p10), %s164_s25, 128, %s1231_s8, [#allocation5]  }
  0x25   : > { %p1083_p9 = scmp.ne.s32.totalorder %s175_s29, %s1082_s9  ;;  %p1090_p4 = scmp.lt.s32.totalorder %s175_s29, %s175_s29 }
  0x26   : > { %p1091_p8 = scmp.lt.s32.totalorder %s1082_s9, %s1082_s9 }
  0x27   : > { %p1085_p1 = pnand %p1083_p9, %p1069_p12 }
  0x28   : > { %p1092_p11 = por %p1091_p8, %p1090_p4 }
  0x29   : > { %p1086_p6 = pneg %p1085_p1 }
  0x2b   : > { %p1093_p13 = pnand %p1092_p11, %p1086_p6 }
  0x2d   : > { %1096 = shalt.err (!%p1093_p13)
}
  0x2e   : > { %s1232_s10 = smov [#allocation6]   ;;  %p72_p2 = scmp.eq.s32.totalorder %s71_s6, 0 }
  0x2f   : > { %1003 = dma.vmem_to_smem (!%p1319_p10), %s175_s29, 16, %s1232_s10, [#allocation7]  }
  0x30   : > { %s74_s11 = sadd.s32 1, %s1225_s17  ;;  %p81_p1 = scmp.ne.s32.totalorder %s1225_s17, %s1221_s16 }
  0x31   : > { %p82_p12 = scmp.eq.s32.totalorder %s1229_s18, 0  ;;  %p1687_p6 = scmp.eq.s32.totalorder %s1286_s19, 3 }
  0x32   : > { %s1339_s12 = scalar_select %p72_p2, %s1225_s17, %s74_s11  }
  0x33   : > { %p83_p4 = por %p82_p12, %p81_p1  ;;  %p1343_p8 = por %p1687_p6, %p81_p1 }
  0x34   : > { %p1017_p0 = scmp.lt.s32.totalorder %s1229_s18, 4  ;;  %s1349_s14 = sand.u32 1, %s1225_s17  }
  0x35   : > { %s1688_s13 = scalar_select %p1343_p8, 1, 0 }
  0x36   : > { %s913_s20 = sshll.u32 %s1349_s14, 4  ;;  %s980_s23 = sshll.u32 %s1229_s18, 8 }
  0x37   : > { %s1356_s27 = scalar_lea.hbm %s1672_s2, %s980_s23  ;;  %s189_s28 = scalar_lea.vmem [#allocation8], %s913_s20 }
  0x38   : > { %s197_s29 = sshll.u32 %s189_s28, 4  ;;  %p1360_p10 = pnand %p1017_p0, %p83_p4  ;;  %s1358_s29 = int_to_ptr.vmem [resolvable:$true] %s197_s29 }
  0x39   : > { %s916_s6 = sshll.u32 %s1349_s14, 3  ;;  %s186_s7 = scalar_lea.sflag [#allocation3], %s1349_s14 }
  0x3a   : > { %s1097_s8 = scalar_lea.hbm %s1356_s27, 256  ;;  %p1099_p5 = pneg %p1360_p10 }
  0x3b   : > { %p1098_p3 = scmp.ne.s32.totalorder %s1356_s27, %s1097_s8  ;;  %s1102_s11 = scalar_lea.hbm %s1672_s2, 1024 }
  0x3c   : > { %p1103_p11 = scmp.lt.s32.totalorder %s1356_s27, %s1672_s2  ;;  %p1104_p13 = scmp.lt.s32.totalorder %s1102_s11, %s1097_s8 }
  0x3d   : > { %p1100_p7 = pnand %p1099_p5, %p1098_p3 }
  0x3e   : > { %p1105_p2 = por %p1104_p13, %p1103_p11 }
  0x3f   : > { %p1101_p9 = pneg %p1100_p7 }
  0x41   : > { %p1106_p1 = pnand %p1105_p2, %p1101_p9 }
  0x43   : > { %1109 = shalt.err (!%p1106_p1)
}
  0x44   : > { %s1110_s24 = scalar_lea.vmem %s1358_s29, 256  ;;  %s1233_s25 = smov [#allocation8]  }
  0x45   : > { %p1111_p12 = scmp.ne.s32.totalorder %s1358_s29, %s1110_s24  ;;  %s1115_s28 = sshll.u32 %s1233_s25, 4  ;;  %s1116_s28 = int_to_ptr.vmem [resolvable:$false] %s1115_s28 }
  0x46   : > { %s1117_s9 = scalar_lea.vmem %s1116_s28, 512  ;;  %p1118_p0 = scmp.lt.s32.totalorder %s1358_s29, %s1116_s28 }
  0x47   : > { %p1113_p4 = pnand %p1111_p12, %p1099_p5  ;;  %p1119_p3 = scmp.lt.s32.totalorder %s1117_s9, %s1110_s24 }
  0x49   : > { %p1114_p6 = pneg %p1113_p4  ;;  %p1120_p7 = por %p1119_p3, %p1118_p0 }
  0x4b   : > { %p1121_p11 = pnand %p1120_p7, %p1114_p6 }
  0x4d   : > { %1124 = shalt.err (!%p1121_p11)
}
  0x4e   : > { %1007 = dma.hbm_to_vmem [thread:$0]  (!%p1360_p10), %s1356_s27, 256, %s1358_s29, %s186_s7  }
  0x4f   : > { %s981_s8 = sshll.u32 %s1229_s18, 7  ;;  %s208_s10 = scalar_lea.vmem [#allocation9], %s916_s6 }
  0x50   : > { %s216_s11 = sshll.u32 %s208_s10, 4  ;;  %s214_s25 = scalar_lea.hbm %s1673_s3, %s981_s8  ;;  %s217_s11 = int_to_ptr.vmem [resolvable:$true] %s216_s11 }
  0x51   : > { %s205_s24 = scalar_lea.sflag [#allocation10], %s1349_s14  ;;  %s1125_s28 = scalar_lea.hbm %s214_s25, 128 }
  0x52   : > { %p1126_p9 = scmp.ne.s32.totalorder %s214_s25, %s1125_s28  ;;  %s1130_s1 = scalar_lea.hbm %s1673_s3, 512 }
  0x53   : > { %p1131_p1 = scmp.lt.s32.totalorder %s214_s25, %s1673_s3  ;;  %p1132_p12 = scmp.lt.s32.totalorder %s1130_s1, %s1125_s28 }
  0x54   : > { %p1128_p13 = pnand %p1126_p9, %p1099_p5 }
  0x55   : > { %p1133_p4 = por %p1132_p12, %p1131_p1 }
  0x56   : > { %p1129_p2 = pneg %p1128_p13 }
  0x58   : > { %p1134_p6 = pnand %p1133_p4, %p1129_p2 }
  0x5a   : > { %1137 = shalt.err (!%p1134_p6)
}
  0x5b   : > { %s1138_s6 = scalar_lea.vmem %s217_s11, 128  ;;  %s1234_s14 = smov [#allocation9]  }
  0x5c   : > { %p1139_p0 = scmp.ne.s32.totalorder %s217_s11, %s1138_s6  ;;  %s1143_s7 = sshll.u32 %s1234_s14, 4  ;;  %s1144_s7 = int_to_ptr.vmem [resolvable:$false] %s1143_s7 }
  0x5d   : > { %s1145_s0 = scalar_lea.vmem %s1144_s7, 256  ;;  %p1146_p11 = scmp.lt.s32.totalorder %s217_s11, %s1144_s7 }
  0x5e   : > { %p1141_p3 = pnand %p1139_p0, %p1099_p5  ;;  %p1147_p9 = scmp.lt.s32.totalorder %s1145_s0, %s1138_s6 }
  0x60   : > { %p1142_p7 = pneg %p1141_p3  ;;  %p1148_p13 = por %p1147_p9, %p1146_p11 }
  0x62   : > { %p1149_p8 = pnand %p1148_p13, %p1142_p7 }
  0x64   : > { %1152 = shalt.err (!%p1149_p8)
}
  0x65   : > { %1010 = dma.hbm_to_vmem [thread:$0]  (!%p1360_p10), %s214_s25, 128, %s217_s11, %s205_s24  }
  0x66   : > { %p1690_p2 = scmp.ne.s32.totalorder %s1684_s26, 0 }
  0x67   : > { %p1691_p1 = scmp.eq.s32.totalorder (!%p1690_p2), %s1286_s19, 0 }
  0x68   : > { %225 = sbr.rel (%p1690_p2) target bundleno = 209 (0xd1), region = 36 }
  0x6d   : > { %1196 = dma.done.wait (%p1691_p1), [#allocation5], 128   ;;  %p1692_p5 = pmov %p1691_p1 }
  0x6e   : > { %p1693_p12 = pmov %p1691_p1 }
  0x6f   : > { %1198 = vsyncadd (%p1692_p5), [#allocation5], 4294967168 }
  0x70   : > { %1200 = dma.done.wait (%p1693_p12), [#allocation7], 16   ;;  %p1694_p4 = pmov %p1691_p1 }
  0x71   : > { %s1420_s1 = sand.u32 1, %s1221_s16   ;;  %p1695_p8 = scmp.ne.s32.totalorder %s1681_s21, 0 }
  0x72   : > { %1202 = vsyncadd (%p1694_p4), [#allocation7], 4294967280  ;;  %s922_s26 = sshll.u32 %s1420_s1, 4  ;;  %s236_s30 = scalar_lea.sflag [#allocation3], %s1420_s1 }
  0x73   : > { %s239_s8 = scalar_lea.vmem [#allocation8], %s922_s26 }
  0x74   : > { %1204 = dma.done.wait (%p1695_p8), %s236_s30, 256  }
  0x75   : > { %1206 = vsyncadd (%p1695_p8), %s236_s30, 4294967040  ;;  %s923_s10 = sshll.u32 %s1420_s1, 3  ;;  %s245_s11 = scalar_lea.sflag [#allocation10], %s1420_s1 }
  0x76   : > { %s1432_s20 = scalar_lea.vmem [#allocation9], %s923_s10 }
  0x77   : > { %1208 = dma.done.wait (%p1695_p8), %s245_s11, 128  }
  0x78   : > { %1210 = vsyncadd (%p1695_p8), %s245_s11, 4294967168 }
  0x79   : > { %253 = sfence }
  0x7a   : > { %s1438_s23 = sld [smem:[#allocation6]]  ;;  %v342_v0 = vlaneseq  ;;  %v1235_v1 = vmov 572653568   ;;  %v1236_v3 = vmov 1717978180   ;;  %v1237_v6 = vmov 858984721  }
  0x7b   : > { %s286_s25 = sld [smem:[#allocation2]]  ;;  %v340_v2 = vunpack.c.l.s4 %v1235_v1  ;;  %v347_v4 = vunpack.c.l.s4 %v1236_v3  ;;  %v362_v7 = vunpack.c.l.s4 %v1237_v6  ;;  %v1238_v10 = vmov 2004309333   ;;  %v1446_v12 = vld [vmem:[%s239_s8] sm:$0xff]  ;;  %v1448_v13 = vld [vmem:[%s239_s8 + $0x8] sm:$0xff]  ;;  %p1696_p6 = scmp.ne.s32.totalorder %s1688_s13, 0 }
  0x7c   : > { %s1440_s24 = sld [smem:[#allocation2 + $0x80]]  ;;  %v343_v5 = vshrl.u32 %v342_v0, 7  ;;  %v369_v11 = vunpack.c.l.s4 %v1238_v10  ;;  %v1480_v30 = vld [vmem:[%s1432_s20] sm:$0xff]  ;;  %vm749_vm0 = vcmask 1040384   ;;  %vm754_vm1 = vcmask 1041408  }
  0x7d   : > { %s1442_s28 = sld [smem:[#allocation2 + $0x100]]  ;;  %v341_v8 = vunpack.c.0.s8 %v340_v2  ;;  %v348_v9 = vunpack.c.0.s8 %v347_v4  ;;  %v363_v14 = vunpack.c.0.s8 %v362_v7  ;;  %vm759_vm2 = vcmask 1042432  }
  0x7e   : > { %s1444_s9 = sld [smem:[#allocation2 + $0x180]]  ;;  %v370_v15 = vunpack.c.0.s8 %v369_v11  ;;  %v1454_v16 = vsub.s32 0, %v343_v5  ;;  %v1456_v17 = vsub.s32 4, %v343_v5 }
  0x7f   : > { %s1450_s21 = sld [smem:[#allocation2 + $0x200]]  ;;  %v1459_v20 = vsub.s32 %v341_v8, %v343_v5  ;;  %v1461_v21 = vsub.s32 %v348_v9, %v343_v5  ;;  %v1468_v25 = vsub.s32 %v363_v14, %v343_v5 }
  0x80   : > { %s1452_s27 = sld [smem:[#allocation2 + $0x280]]  ;;  %v290_v19 = vstv %s1438_s23  ;;  %v1475_v29 = vsub.s32 %v370_v15, %v343_v5 }
  0x81   : > { %v287_v18 = vstv %s286_s25  ;;  %s1463_s29 = sld [smem:[#allocation6 + $0x1]] }
  0x82   : > { %v288_v22 = vmul.f32 %v287_v18, %v1446_v12  ;;  %v289_v23 = vmul.f32 %v287_v18, %v1448_v13  ;;  %v294_v24 = vstv %s1440_s24  ;;  %s1470_s6 = sld [smem:[#allocation2 + $0x1]] }
  0x83   : > { %v295_v26 = vmul.f32 %v294_v24, %v1446_v12  ;;  %v296_v27 = vmul.f32 %v294_v24, %v1448_v13  ;;  %v308_v28 = vstv %s1442_s28  ;;  %s1477_s14 = sld [smem:[#allocation2 + $0x81]] }
  0x84   : > { %v291_v31 = vadd.f32 %v290_v19, %v288_v22  ;;  %v292_v32 = vadd.f32 %v290_v19, %v289_v23  ;;  %v309_v33 = vmul.f32 %v308_v28, %v1446_v12  ;;  %v310_v34 = vmul.f32 %v308_v28, %v1448_v13  ;;  %s1484_s7 = sld [smem:[#allocation2 + $0x101]] }
  0x85   : > { %v926_v35 = vrot.slane %v295_v26, 9  ;;  %v927_v36 = vrot.slane %v296_v27, 9  ;;  %v322_v37 = vstv %s1444_s9  ;;  %v336_v38 = vstv %s1450_s21  ;;  %s1488_s0 = sld [smem:[#allocation2 + $0x181]] }
  0x86   : > { %v929_v39 = vrot.slane %v309_v33, 10  ;;  %v930_v40 = vrot.slane %v310_v34, 10  ;;  %v323_v41 = vmul.f32 %v322_v37, %v1446_v12  ;;  %v324_v42 = vmul.f32 %v322_v37, %v1448_v13  ;;  %s1492_s30 = sld [smem:[#allocation2 + $0x201]] }
  0x87   : > { %v305_v43 = vadd.f32 %v926_v35, %v291_v31  ;;  %v306_v44 = vadd.f32 %v927_v36, %v292_v32  ;;  %v337_v45 = vmul.f32 %v336_v38, %v1480_v30  ;;  %v358_v46 = vstv %s1452_s27  ;;  %s1496_s8 = sld [smem:[#allocation2 + $0x281]] }
  0x88   : > { %v932_v47 = vrot.slane %v323_v41, 11  ;;  %v933_v48 = vrot.slane %v324_v42, 11  ;;  %v359_v49 = vmul.f32 %v358_v46, %v1480_v30  ;;  %v381_v50 = vstv %s1470_s6  ;;  %s1500_s10 = sld [smem:[#allocation6 + $0x2]] }
  0x89   : > { %v319_v51 = vadd.f32 %v929_v39, %v305_v43  ;;  %v320_v52 = vadd.f32 %v930_v40, %v306_v44  ;;  %v345_v53 = vrot.slane %v337_v45, %v1459_v20  ;;  %v352_v54 = vrot.slane %v337_v45, %v1461_v21  ;;  %s1504_s11 = sld [smem:[#allocation2 + $0x2]] }
  0x8a   : > { %v367_v55 = vrot.slane %v359_v49, %v1468_v25  ;;  %v374_v56 = vrot.slane %v359_v49, %v1475_v29  ;;  %v382_v57 = vmul.f32 %v381_v50, %v1446_v12  ;;  %v383_v58 = vmul.f32 %v381_v50, %v1448_v13  ;;  %s1510_s20 = sld [smem:[#allocation2 + $0x82]] }
  0x8b   : > { %v333_v59 = vadd.f32 %v932_v47, %v319_v51  ;;  %v334_v60 = vadd.f32 %v933_v48, %v320_v52  ;;  %v384_v61 = vstv %s1463_s29  ;;  %v388_v62 = vstv %s1477_s14  ;;  %s1514_s23 = sld [smem:[#allocation2 + $0x102]] }
  0x8c   : > { %v385_v63 = vadd.f32 %v384_v61, %v382_v57  ;;  %v386_v0 = vadd.f32 %v384_v61, %v383_v58  ;;  %v389_v1 = vmul.f32 %v388_v62, %v1446_v12  ;;  %v390_v2 = vmul.f32 %v388_v62, %v1448_v13  ;;  %s1528_s25 = sld [smem:[#allocation2 + $0x182]] }
  0x8d   : > { %v355_v3 = vadd.f32 %v345_v53, %v333_v59  ;;  %v356_v4 = vadd.f32 %v352_v54, %v334_v60  ;;  %v402_v5 = vstv %s1484_s7  ;;  %v416_v6 = vstv %s1488_s0  ;;  %s1530_s24 = sld [smem:[#allocation2 + $0x202]]  ;;  %s982_s0 = sshll.u32 %s1286_s19, 8 }
  0x8e   : > { %v939_v7 = vrot.slane %v389_v1, 9  ;;  %v940_v8 = vrot.slane %v390_v2, 9  ;;  %v403_v9 = vmul.f32 %v402_v5, %v1446_v12  ;;  %v404_v10 = vmul.f32 %v402_v5, %v1448_v13  ;;  %s1534_s28 = sld [smem:[#allocation2 + $0x282]]  ;;  %s1239_s19 = smov [#allocation11]  }
  0x8f   : > { %v1522_v11 = vadd.f32 %v367_v55, %v355_v3  ;;  %v1524_v14 = vadd.f32 %v374_v56, %v356_v4  ;;  %v417_v15 = vmul.f32 %v416_v6, %v1446_v12  ;;  %v418_v18 = vmul.f32 %v416_v6, %v1448_v13  ;;  %s1538_s9 = sld [smem:[#allocation6 + $0x3]] }
  0x90   : > { %v399_v19 = vadd.f32 %v939_v7, %v385_v63  ;;  %v400_v22 = vadd.f32 %v940_v8, %v386_v0  ;;  %v942_v23 = vrot.slane %v403_v9, 10  ;;  %v943_v24 = vrot.slane %v404_v10, 10  ;;  %s1544_s21 = sld [smem:[#allocation2 + $0x3]] }
  0x91   : > { %v945_v26 = vrot.slane %v417_v15, 11  ;;  %v946_v27 = vrot.slane %v418_v18, 11  ;;  %v430_v28 = vstv %s1492_s30  ;;  %v452_v31 = vstv %s1496_s8  ;;  %s1554_s27 = sld [smem:[#allocation2 + $0x83]]  ;;  %s278_s30 = scalar_lea.vmem [#allocation11], %s922_s26 }
  0x92   : > { %v413_v32 = vadd.f32 %v942_v23, %v399_v19  ;;  %v414_v33 = vadd.f32 %v943_v24, %v400_v22  ;;  %v431_v34 = vmul.f32 %v430_v28, %v1480_v30  ;;  %v453_v35 = vmul.f32 %v452_v31, %v1480_v30  ;;  %s1558_s29 = sld [smem:[#allocation2 + $0x103]]  ;;  %s793_s8 = sshll.u32 %s278_s30, 4  ;;  %s794_s8 = int_to_ptr.vmem [resolvable:$true] %s793_s8 }
  0x93   : > { %v475_v36 = vstv %s1504_s11  ;;  %v478_v37 = vstv %s1500_s10  ;;  %v482_v38 = vstv %s1510_s20  ;;  %v496_v39 = vstv %s1514_s23  ;;  %s1564_s6 = sld [smem:[#allocation2 + $0x183]]  ;;  %s791_s20 = scalar_lea.hbm %s1674_s4, %s982_s0 }
  0x94   : > { %v427_v40 = vadd.f32 %v945_v26, %v413_v32  ;;  %v428_v41 = vadd.f32 %v946_v27, %v414_v33  ;;  %v439_v42 = vrot.slane %v431_v34, %v1459_v20  ;;  %v446_v43 = vrot.slane %v431_v34, %v1461_v21  ;;  %s1568_s14 = sld [smem:[#allocation2 + $0x203]]  ;;  %s779_s23 = scalar_lea.sflag [#allocation4], %s1420_s1 }
  0x95   : > { %v461_v44 = vrot.slane %v453_v35, %v1468_v25  ;;  %v468_v45 = vrot.slane %v453_v35, %v1475_v29  ;;  %v476_v46 = vmul.f32 %v475_v36, %v1446_v12  ;;  %v477_v47 = vmul.f32 %v475_v36, %v1448_v13  ;;  %s1576_s7 = sld [smem:[#allocation2 + $0x283]]  ;;  %s1157_s26 = sshll.u32 %s1239_s19, 4  ;;  %s1158_s26 = int_to_ptr.vmem [resolvable:$false] %s1157_s26 }
  0x96   : > { %v449_v48 = vadd.f32 %v439_v42, %v427_v40  ;;  %v450_v49 = vadd.f32 %v446_v43, %v428_v41  ;;  %v483_v50 = vmul.f32 %v482_v38, %v1446_v12  ;;  %v484_v51 = vmul.f32 %v482_v38, %v1448_v13  ;;  %p1160_p7 = scmp.lt.s32.totalorder %s794_s8, %s1158_s26 }
  0x97   : > { %v479_v52 = vadd.f32 %v478_v37, %v476_v46  ;;  %v480_v53 = vadd.f32 %v478_v37, %v477_v47  ;;  %v497_v54 = vmul.f32 %v496_v39, %v1446_v12  ;;  %v498_v55 = vmul.f32 %v496_v39, %v1448_v13 }
  0x98   : > { %v1560_v56 = vadd.f32 %v461_v44, %v449_v48  ;;  %v1562_v57 = vadd.f32 %v468_v45, %v450_v49  ;;  %v952_v58 = vrot.slane %v483_v50, 9  ;;  %v953_v59 = vrot.slane %v484_v51, 9 }
  0x99   : > { %v955_v60 = vrot.slane %v497_v54, 10  ;;  %v956_v61 = vrot.slane %v498_v55, 10  ;;  %v510_v62 = vstv %s1528_s25  ;;  %v524_v63 = vstv %s1530_s24  ;;  %s1153_s25 = scalar_lea.vmem %s794_s8, 256  ;;  %s1159_s24 = scalar_lea.vmem %s1158_s26, 512 }
  0x9a   : > { %v493_v0 = vadd.f32 %v952_v58, %v479_v52  ;;  %v494_v1 = vadd.f32 %v953_v59, %v480_v53  ;;  %v511_v2 = vmul.f32 %v510_v62, %v1446_v12  ;;  %v512_v3 = vmul.f32 %v510_v62, %v1448_v13  ;;  %p1154_p10 = scmp.ne.s32.totalorder %s794_s8, %s1153_s25  ;;  %p1161_p11 = scmp.lt.s32.totalorder %s1159_s24, %s1153_s25 }
  0x9b   : > { %v525_v4 = vmul.f32 %v524_v63, %v1480_v30  ;;  %v546_v5 = vstv %s1534_s28  ;;  %v569_v6 = vstv %s1544_s21  ;;  %v572_v7 = vstv %s1538_s9 }
  0x9c   : > { %v507_v8 = vadd.f32 %v955_v60, %v493_v0  ;;  %v508_v9 = vadd.f32 %v956_v61, %v494_v1  ;;  %v958_v10 = vrot.slane %v511_v2, 11  ;;  %v959_v15 = vrot.slane %v512_v3, 11  ;;  %p1155_p0 = pnand %p1154_p10, %p1696_p6  ;;  %p1162_p9 = por %p1161_p11, %p1160_p7 }
  0x9d   : > { %v533_v18 = vrot.slane %v525_v4, %v1459_v20  ;;  %v540_v19 = vrot.slane %v525_v4, %v1461_v21  ;;  %v547_v22 = vmul.f32 %v546_v5, %v1480_v30  ;;  %v570_v23 = vmul.f32 %v569_v6, %v1446_v12 }
  0x9e   : > { %v521_v24 = vadd.f32 %v958_v10, %v507_v8  ;;  %v522_v26 = vadd.f32 %v959_v15, %v508_v9  ;;  %v571_v27 = vmul.f32 %v569_v6, %v1448_v13  ;;  %v576_v28 = vstv %s1554_s27  ;;  %p1156_p3 = pneg %p1155_p0 }
  0x9f   : > { %v555_v31 = vrot.slane %v547_v22, %v1468_v25  ;;  %v562_v32 = vrot.slane %v547_v22, %v1475_v29  ;;  %v573_v33 = vadd.f32 %v572_v7, %v570_v23  ;;  %v577_v34 = vmul.f32 %v576_v28, %v1446_v12 }
  0xa0   : > { %v543_v35 = vadd.f32 %v533_v18, %v521_v24  ;;  %v544_v36 = vadd.f32 %v540_v19, %v522_v26  ;;  %v574_v37 = vadd.f32 %v572_v7, %v571_v27  ;;  %v578_v38 = vmul.f32 %v576_v28, %v1448_v13  ;;  %p1163_p13 = pnand %p1162_p9, %p1156_p3 }
  0xa1   : > { %v965_v39 = vrot.slane %v577_v34, 9  ;;  %v590_v40 = vstv %s1558_s29  ;;  %v604_v41 = vstv %s1564_s6  ;;  %v618_v42 = vstv %s1568_s14 }
  0xa2   : > { %v565_v43 = vadd.f32 %v555_v31, %v543_v35  ;;  %v566_v44 = vadd.f32 %v562_v32, %v544_v36  ;;  %v966_v45 = vrot.slane %v578_v38, 9  ;;  %v591_v46 = vmul.f32 %v590_v40, %v1446_v12 }
  0xa3   : > { %v587_v47 = vadd.f32 %v965_v39, %v573_v33  ;;  %v592_v48 = vmul.f32 %v590_v40, %v1448_v13  ;;  %v605_v49 = vmul.f32 %v604_v41, %v1446_v12  ;;  %v606_v50 = vmul.f32 %v604_v41, %v1448_v13 }
  0xa4   : > { %v588_v51 = vadd.f32 %v966_v45, %v574_v37  ;;  %v968_v52 = vrot.slane %v591_v46, 10  ;;  %v619_v53 = vmul.f32 %v618_v42, %v1480_v30  ;;  %v640_v54 = vstv %s1576_s7 }
  0xa5   : > { %v969_v55 = vrot.slane %v592_v48, 10  ;;  %v971_v58 = vrot.slane %v605_v49, 11  ;;  %v972_v59 = vrot.slane %v606_v50, 11  ;;  %v641_v60 = vmul.f32 %v640_v54, %v1480_v30 }
  0xa6   : > { %v601_v61 = vadd.f32 %v968_v52, %v587_v47  ;;  %v627_v62 = vrot.slane %v619_v53, %v1459_v20  ;;  %v634_v63 = vrot.slane %v619_v53, %v1461_v21  ;;  %v666_v12 = vrot.slane %v1522_v11, %v1454_v16 }
  0xa7   : > { %v602_v0 = vadd.f32 %v969_v55, %v588_v51  ;;  %v649_v13 = vrot.slane %v641_v60, %v1468_v25  ;;  %v656_v1 = vrot.slane %v641_v60, %v1475_v29  ;;  %v670_v2 = vrot.slane %v1522_v11, %v1456_v17 }
  0xa8   : > { %v615_v3 = vadd.f32 %v971_v58, %v601_v61  ;;  %v674_v30 = vrot.slane %v1524_v14, %v1454_v16  ;;  %v678_v20 = vrot.slane %v1524_v14, %v1456_v17  ;;  %v688_v21 = vrot.slane %v1560_v56, %v1454_v16 }
  0xa9   : > { %v616_v4 = vadd.f32 %v972_v59, %v602_v0  ;;  %v692_v5 = vrot.slane %v1560_v56, %v1456_v17  ;;  %v696_v25 = vrot.slane %v1562_v57, %v1454_v16  ;;  %v700_v29 = vrot.slane %v1562_v57, %v1456_v17 }
  0xaa   : > { %v637_v11 = vadd.f32 %v627_v62, %v615_v3  ;;  %v710_v6 = vrot.slane %v565_v43, %v1454_v16  ;;  %v714_v7 = vrot.slane %v565_v43, %v1456_v17  ;;  %v718_v14 = vrot.slane %v566_v44, %v1454_v16 }
  0xab   : > { %v638_v8 = vadd.f32 %v634_v63, %v616_v4  ;;  %v722_v9 = vrot.slane %v566_v44, %v1456_v17  ;;  %v750_v10 = vsel %vm749_vm0, %v666_v12, %v688_v21  ;;  %v751_v56 = vsel %vm749_vm0, %v670_v2, %v692_v5 }
  0xac   : > { %v659_v15 = vadd.f32 %v649_v13, %v637_v11  ;;  %v752_v18 = vsel %vm749_vm0, %v674_v30, %v696_v25  ;;  %v753_v19 = vsel %vm749_vm0, %v678_v20, %v700_v29  ;;  %v755_v22 = vsel %vm754_vm1, %v750_v10, %v710_v6 }
  0xad   : > { %v660_v57 = vadd.f32 %v656_v1, %v638_v8  ;;  %v756_v23 = vsel %vm754_vm1, %v751_v56, %v714_v7  ;;  %v757_v27 = vsel %vm754_vm1, %v752_v18, %v718_v14  ;;  %v758_v28 = vsel %vm754_vm1, %v753_v19, %v722_v9 }
  0xae   : > { %v732_v24 = vrot.slane %v659_v15, %v1454_v16  ;;  %v736_v26 = vrot.slane %v659_v15, %v1456_v17 }
  0xaf   : > { %v740_v31 = vrot.slane %v660_v57, %v1454_v16  ;;  %v744_v32 = vrot.slane %v660_v57, %v1456_v17 }
  0xb0   : > { %v760_v33 = vsel %vm759_vm2, %v755_v22, %v732_v24  ;;  %v761_v34 = vsel %vm759_vm2, %v756_v23, %v736_v26 }
  0xb1   : > { %v762_v35 = vsel %vm759_vm2, %v757_v27, %v740_v31  ;;  %v763_v36 = vsel %vm759_vm2, %v758_v28, %v744_v32  ;;  %1059 = vtanh.f32 %v760_v33 }
  0xb2   : > { %1061 = vtanh.f32 %v761_v34 }
  0xb3   : > { %1063 = vtanh.f32 %v762_v35 }
  0xb4   : > { %1065 = vtanh.f32 %v763_v36 }
  0xbe   : > { %v1060_v37 = vpop.eup %1059 }
  0xbf   : > { %v1062_v38 = vpop.eup %1061 }
  0xc0   : > { %v1064_v39 = vpop.eup %1063  ;;  %v772_v16 = vcombine.low %v1060_v37, %v1062_v38 }
  0xc1   : > { %v1066_v40 = vpop.eup %1065 }
  0xc2   : > { %v773_v17 = vcombine.low %v1064_v39, %v1066_v40  ;;  %776 = vst [vmem:[%s278_s30] sm:$0xff] %v772_v16 }
  0xc4   : > { %777 = vst [vmem:[%s278_s30 + $0x8] sm:$0xff] %v773_v17 }
  0xc5   : > { %1166 = shalt.err (!%p1163_p13)
}
  0xc6   : > { %s1167_s28 = scalar_lea.hbm %s791_s20, 256  ;;  %s1171_s21 = scalar_lea.hbm %s1674_s4, 1024 }
  0xc7   : > { %p1168_p2 = scmp.ne.s32.totalorder %s791_s20, %s1167_s28  ;;  %p1172_p12 = scmp.lt.s32.totalorder %s791_s20, %s1674_s4 }
  0xc8   : > { %p1173_p4 = scmp.lt.s32.totalorder %s1171_s21, %s1167_s28 }
  0xc9   : > { %p1169_p1 = pnand %p1168_p2, %p1696_p6 }
  0xca   : > { %p1174_p8 = por %p1173_p4, %p1172_p12 }
  0xcb   : > { %p1170_p5 = pneg %p1169_p1 }
  0xcd   : > { %p1175_p10 = pnand %p1174_p8, %p1170_p5 }
  0xcf   : > { %1178 = shalt.err (!%p1175_p10)
}
  0xd0   : > { %995 = dma.vmem_to_hbm [thread:$0]  (%p1696_p6), %s794_s8, 256, %s791_s20, %s779_s23  }
  0xd1 PF: > { %p1020_p0 = scmp.ge.s32.totalorder %s1229_s18, 2  ;;  %s805_s6 = sand.u32 1, %s1217_s15  }
  0xd2   : > { %p1697_p3 = scmp.ne.s32.totalorder %s1682_s22, 0  ;;  %s806_s14 = scalar_lea.sflag [#allocation4], %s805_s6 }
  0xd4   : > { %p1012_p7 = pnand %p1020_p0, %p1697_p3 }
  0xd6   : > { %p1013_p11 = pneg %p1012_p7 }
  0xd8   : > { %1212 = dma.done.wait (%p1013_p11), %s806_s14, 256  }
  0xd9   : > { %1214 = vsyncadd (%p1013_p11), %s806_s14, 4294967040  ;;  %p22_p9 = scmp.ge.s32.totalorder %s1324_s5, 6   ;;  %s1698_s15 = smov %s1221_s16 }
  0xda   : > { %s1699_s16 = smov %s1225_s17  ;;  %s1700_s17 = smov %s1339_s12 }
  0xdb   : > { %s1701_s18 = smov %s1324_s5  ;;  %24 = sbr.rel (!%p22_p9) target bundleno = 12 (0xc), region = 103 }
  0xe0   :  { %811 = vsyncpa [#allocation3], 1 }
  0xe1   :  { %813 = vsyncpa [#allocation3 + $0x1], 1 }
  0xe2   :  { %814 = vsyncpa [#allocation10], 1 }
  0xe3   :  { %816 = vsyncpa [#allocation10 + $0x1], 1 }
  0xe4   :  { %817 = vsyncpa [#allocation4], 1 }
  0xe5   :  { %819 = vsyncpa [#allocation4 + $0x1], 1 }
  0xe6   :  { %820 = vsyncpa [#allocation5], 1 }
  0xe7   :  { %822 = vsyncpa [#allocation5 + $0x1], 1 }
  0xe8   :  { %823 = vsyncpa [#allocation7], 1 }

</bundles_post_ra>
